<compile_context>
chip_gen: v7x
topology: tpu7x:2x2x1
jax: 0.10.0
libtpu: 0.0.40
codegen_flags: <defaults>
</compile_context>

<pallas_src>
import jax
import jax.numpy as jnp
from jax.experimental import pallas as pl
from jax.experimental.pallas import tpu as pltpu


def inception_kernel(x_ref, w_ref, b_ref, o_ref):
    # x_ref : (Bt, H, 64)   batch tile of inputs
    # w_ref : (64, 48)      packed conv weights
    # b_ref : (8, T)        per-(channel, time) bias slab, T = 3H-3
    # o_ref : (Bt, 8, T)    output tile (channels, concatenated time)
    Bt, H, W = x_ref.shape

    # Fold batch into the matmul M dimension: one big MXU pass for all 3 conv banks.
    x2d = x_ref[...].reshape(Bt * H, W)                                  # (Bt*H, 64)
    P = jnp.dot(x2d, w_ref[...], preferred_element_type=jnp.float32)    # (Bt*H, 48)

    # (Bt, H, 48) -> (Bt, 48, H): single batched minor-dim transpose so the
    # shift-adds and concat below are already in output (channel, time) layout.
    Pt = jnp.transpose(P.reshape(Bt, H, 48), (0, 2, 1))                  # (Bt, 48, H)

    # conv1: kernel height 1 -> H outputs
    y1 = Pt[:, 0:8, :]                                                   # (Bt, 8, H)
    # conv2: kernel height 2 -> H-1 outputs (tap h and h+1)
    y2 = Pt[:, 8:16, : H - 1] + Pt[:, 16:24, 1:H]                        # (Bt, 8, H-1)
    # conv3: kernel height 3 -> H-2 outputs (taps h, h+1, h+2)
    y3 = (Pt[:, 24:32, : H - 2] + Pt[:, 32:40, 1 : H - 1]
          + Pt[:, 40:48, 2:H])                                           # (Bt, 8, H-2)

    # Assemble the whole (channels, concatenated time) block and store it once.
    blk = jnp.concatenate([y1, y2, y3], axis=-1) + b_ref[...][None]      # (Bt, 8, T)
    o_ref[...] = blk.astype(o_ref.dtype)


def inception_forward(x, w1, b1, w2, b2, w3, b3, *, block_batch=None):
    """x: (n, 1, H, 64) NCHW, float32. Returns (n, 8*(3H-3)) matching PyTorch."""
    n, cin, H, W = x.shape
    assert cin == 1 and W == 64 and H >= 3
    T = 3 * H - 3
    xs = x.reshape(n, H, W).astype(jnp.float32)

    # Pack conv weights (out=8, in=1, kh, kw=64) into one (64, 48) matmul RHS.
    w_cat = jnp.concatenate(
        [w1[:, 0, 0, :].T,                                   # cols  0: 8  conv1 kh=0
         w2[:, 0, 0, :].T, w2[:, 0, 1, :].T,                 # cols  8:24  conv2 kh=0,1
         w3[:, 0, 0, :].T, w3[:, 0, 1, :].T, w3[:, 0, 2, :].T],  # cols 24:48
        axis=1).astype(jnp.float32)                          # (64, 48)

    # Pre-broadcast biases into one (8, T) slab in output (channel, time) layout.
    b_full = jnp.concatenate(
        [jnp.broadcast_to(b1[:, None], (8, H)),
         jnp.broadcast_to(b2[:, None], (8, H - 1)),
         jnp.broadcast_to(b3[:, None], (8, H - 2))],
        axis=1).astype(jnp.float32)                          # (8, T)

    # Batch tile: aim for >=256 matmul rows per grid step (fills v6e/v7x MXU).
    if block_batch is None:
        block_batch = max(1, 256 // H)
    bt = min(block_batch, n)
    num_blocks = pl.cdiv(n, bt)
    n_pad = num_blocks * bt
    if n_pad != n:
        xs = jnp.pad(xs, ((0, n_pad - n), (0, 0), (0, 0)))

    cost = pl.CostEstimate(
        flops=2 * n_pad * H * 64 * 48,
        transcendentals=0,
        bytes_accessed=(n_pad * H * 64 + 64 * 48 + 8 * T + n_pad * 8 * T) * 4,
    )

    out = pl.pallas_call(
        inception_kernel,
        out_shape=jax.ShapeDtypeStruct((n_pad, 8, T), jnp.float32),
        grid=(num_blocks,),
        in_specs=[
            pl.BlockSpec((bt, H, W), lambda i: (i, 0, 0)),
            pl.BlockSpec((W, 48), lambda i: (0, 0)),
            pl.BlockSpec((8, T), lambda i: (0, 0)),
        ],
        out_specs=pl.BlockSpec((bt, 8, T), lambda i: (i, 0, 0)),
        compiler_params=pltpu.CompilerParams(dimension_semantics=("parallel",)),
        cost_estimate=cost,
    )(xs, w_cat, b_full)

    # torch: cat((x1,x2,x3), dim=2).view(n, -1) -> row-major flatten of (8, T).
    return out[:n].reshape(n, -1)


def inception_reference(x, w1, b1, w2, b2, w3, b3):
    """Pure-JAX reference mirroring the PyTorch forward exactly."""
    n, _, H, W = x.shape
    xs = x[:, 0]                                   # (n, H, 64)
    y1 = jnp.einsum("nhw,cw->nch", xs, w1[:, 0, 0, :]) + b1[None, :, None]
    y2 = (jnp.einsum("nhw,cw->nch", xs[:, : H - 1], w2[:, 0, 0, :])
          + jnp.einsum("nhw,cw->nch", xs[:, 1:], w2[:, 0, 1, :])
          + b2[None, :, None])
    y3 = (jnp.einsum("nhw,cw->nch", xs[:, : H - 2], w3[:, 0, 0, :])
          + jnp.einsum("nhw,cw->nch", xs[:, 1 : H - 1], w3[:, 0, 1, :])
          + jnp.einsum("nhw,cw->nch", xs[:, 2:], w3[:, 0, 2, :])
          + b3[None, :, None])
    return jnp.concatenate([y1, y2, y3], axis=2).reshape(n, -1)


if __name__ == "__main__":
    key = jax.random.PRNGKey(0)
    kx, k1, k2, k3, kb1, kb2, kb3 = jax.random.split(key, 7)

    n, H, W = 2, 8, 64                             # input: (n, 1, H, 64)
    x = jax.random.normal(kx, (n, 1, H, W), dtype=jnp.float32)

    # Deterministic "conv" parameters (shapes from nn.Conv2d in __init__).
    w1 = 0.1 * jax.random.normal(k1, (8, 1, 1, 64), dtype=jnp.float32)
    w2 = 0.1 * jax.random.normal(k2, (8, 1, 2, 64), dtype=jnp.float32)
    w3 = 0.1 * jax.random.normal(k3, (8, 1, 3, 64), dtype=jnp.float32)
    b1 = 0.1 * jax.random.normal(kb1, (8,), dtype=jnp.float32)
    b2 = 0.1 * jax.random.normal(kb2, (8,), dtype=jnp.float32)
    b3 = 0.1 * jax.random.normal(kb3, (8,), dtype=jnp.float32)

    # Small shape from the spec.
    out = inception_forward(x, w1, b1, w2, b2, w3, b3)
    out = jax.block_until_ready(out)
    ref = inception_reference(x, w1, b1, w2, b2, w3, b3)
    assert out.shape == (n, 8 * (3 * H - 3)), out.shape
    assert jnp.allclose(out, ref, atol=1e-4, rtol=1e-4), "mismatch vs reference (n=2)"

    # Exercise batch tiling, multi-block grid and the ragged-tail padding path.
    n2 = 70
    x2 = jax.random.normal(jax.random.PRNGKey(1), (n2, 1, H, W), dtype=jnp.float32)
    out2 = jax.block_until_ready(inception_forward(x2, w1, b1, w2, b2, w3, b3))
    ref2 = inception_reference(x2, w1, b1, w2, b2, w3, b3)
    assert out2.shape == (n2, 8 * (3 * H - 3)), out2.shape
    assert jnp.allclose(out2, ref2, atol=1e-4, rtol=1e-4), "mismatch vs reference (n=70)"

    print("KERNEL_OK")
</pallas_src>

<mosaic_0001>
module attributes {stable_mosaic.version = 11 : i64} {
  func.func @inception_kernel(%arg0: i32, %arg1: memref<2x8x64xf32, #tpu.memory_space<vmem>>, %arg2: memref<64x48xf32, #tpu.memory_space<vmem>>, %arg3: memref<8x21xf32, #tpu.memory_space<vmem>>, %arg4: memref<2x8x21xf32, #tpu.memory_space<vmem>>) attributes {dimension_semantics = [#tpu.dimension_semantics<parallel>], iteration_bounds = array<i64: 1>, scalar_prefetch = 0 : i64, scratch_operands = 0 : i64, tpu.core_type = #tpu.core_type<tc>, window_params = [{transform_indices = @transform_0, window_bounds = array<i64: 2, 8, 64>}, {pipeline_mode = #tpu.pipeline_mode<synchronous>, transform_indices = @transform_1, window_bounds = array<i64: 64, 48>}, {pipeline_mode = #tpu.pipeline_mode<synchronous>, transform_indices = @transform_2, window_bounds = array<i64: 8, 21>}, {transform_indices = @transform_3, window_bounds = array<i64: 2, 8, 21>}]} {
    %c0 = arith.constant 0 : index
    %c0_0 = arith.constant 0 : index
    %c0_1 = arith.constant 0 : index
    %0 = vector.load %arg1[%c0, %c0_0, %c0_1] : memref<2x8x64xf32, #tpu.memory_space<vmem>>, vector<2x8x64xf32>
    %1 = vector.shape_cast %0 : vector<2x8x64xf32> to vector<16x64xf32>
    %c0_2 = arith.constant 0 : index
    %c0_3 = arith.constant 0 : index
    %2 = vector.load %arg2[%c0_2, %c0_3] : memref<64x48xf32, #tpu.memory_space<vmem>>, vector<64x48xf32>
    %cst = arith.constant dense<0.000000e+00> : vector<16x48xf32>
    %3 = tpu.matmul %1, %2, %cst {dimension_numbers = #tpu.dot_dimension_numbers<[1], [0], [0], [1], [0, 0, 1, 1], [], []>} : vector<16x64xf32>, vector<64x48xf32>, vector<16x48xf32> -> vector<16x48xf32>
    %4 = vector.shape_cast %3 : vector<16x48xf32> to vector<2x8x48xf32>
    %5 = tpu.transpose %4, [0, 2, 1] : vector<2x8x48xf32> -> vector<2x48x8xf32>
    %6 = vector.extract_strided_slice %5 {offsets = [0, 0, 0], sizes = [2, 8, 8], strides = [1, 1, 1]} : vector<2x48x8xf32> to vector<2x8x8xf32>
    %7 = vector.extract_strided_slice %5 {offsets = [0, 8, 0], sizes = [2, 8, 7], strides = [1, 1, 1]} : vector<2x48x8xf32> to vector<2x8x7xf32>
    %8 = vector.extract_strided_slice %5 {offsets = [0, 16, 1], sizes = [2, 8, 7], strides = [1, 1, 1]} : vector<2x48x8xf32> to vector<2x8x7xf32>
    %9 = arith.addf %7, %8 : vector<2x8x7xf32>
    %10 = vector.extract_strided_slice %5 {offsets = [0, 24, 0], sizes = [2, 8, 6], strides = [1, 1, 1]} : vector<2x48x8xf32> to vector<2x8x6xf32>
    %11 = vector.extract_strided_slice %5 {offsets = [0, 32, 1], sizes = [2, 8, 6], strides = [1, 1, 1]} : vector<2x48x8xf32> to vector<2x8x6xf32>
    %12 = arith.addf %10, %11 : vector<2x8x6xf32>
    %13 = vector.extract_strided_slice %5 {offsets = [0, 40, 2], sizes = [2, 8, 6], strides = [1, 1, 1]} : vector<2x48x8xf32> to vector<2x8x6xf32>
    %14 = arith.addf %12, %13 : vector<2x8x6xf32>
    %15 = tpu.concatenate %6, %9, %14 in 2 : vector<2x8x8xf32>, vector<2x8x7xf32>, vector<2x8x6xf32> -> vector<2x8x21xf32>
    %c0_4 = arith.constant 0 : index
    %c0_5 = arith.constant 0 : index
    %16 = vector.load %arg3[%c0_4, %c0_5] : memref<8x21xf32, #tpu.memory_space<vmem>>, vector<8x21xf32>
    %17 = vector.shape_cast %16 : vector<8x21xf32> to vector<1x8x21xf32>
    %18 = vector.broadcast %17 : vector<1x8x21xf32> to vector<2x8x21xf32>
    %19 = arith.addf %15, %18 : vector<2x8x21xf32>
    %c0_6 = arith.constant 0 : index
    %c0_7 = arith.constant 0 : index
    %c0_8 = arith.constant 0 : index
    %20 = vector.load %arg4[%c0_6, %c0_7, %c0_8] : memref<2x8x21xf32, #tpu.memory_space<vmem>>, vector<2x8x21xf32>
    tpu.vector_store %arg4[%c0_6, %c0_7, %c0_8], %19 {strides = array<i32>} : memref<2x8x21xf32, #tpu.memory_space<vmem>>, vector<2x8x21xf32>,
    return
  }
  func.func @transform_0(%arg0: i32) -> (i32, i32, i32) {
    %c0_i32 = arith.constant 0 : i32
    %c0_i32_0 = arith.constant 0 : i32
    %c0_i32_1 = arith.constant 0 : i32
    return %arg0, %c0_i32, %c0_i32_0 : i32, i32, i32
  }
  func.func @transform_1(%arg0: i32) -> (i32, i32) {
    %c0_i32 = arith.constant 0 : i32
    %c0_i32_0 = arith.constant 0 : i32
    %c0_i32_1 = arith.constant 0 : i32
    return %c0_i32, %c0_i32_0 : i32, i32
  }
  func.func @transform_2(%arg0: i32) -> (i32, i32) {
    %c0_i32 = arith.constant 0 : i32
    %c0_i32_0 = arith.constant 0 : i32
    %c0_i32_1 = arith.constant 0 : i32
    return %c0_i32, %c0_i32_0 : i32, i32
  }
  func.func @transform_3(%arg0: i32) -> (i32, i32, i32) {
    %c0_i32 = arith.constant 0 : i32
    %c0_i32_0 = arith.constant 0 : i32
    %c0_i32_1 = arith.constant 0 : i32
    return %arg0, %c0_i32, %c0_i32_0 : i32, i32, i32
  }
}

</mosaic_0001>

<bundles_post_ra>
// kernel: tpu_custom_call.1
= control target key start
LH: loop header
LB: loop body
LE: loop exit
PB: predicated region body
PF: predicated region fallthrough
CT: control target
= control target key end

     0   :  { %vm25_vm0 = vcmask 523264   ;;  %s399_s0 = inlined_call_operand.vmem [shape: f32[2,8,64], index: 0, kind: input, shape index: {}]   ;;  %s400_s1 = inlined_call_operand.vmem [shape: f32[64,48], index: 1, kind: input, shape index: {}]   ;;  %s401_s2 = inlined_call_operand.vmem [shape: f32[8,21], index: 2, kind: input, shape index: {}]   ;;  %s402_s3 = inlined_call_operand.hbm [shape: f32[2,8,21], index: 3, kind: output, shape index: {}]  }
   0x1   :  { %v17_v0 = vld [vmem:[%s400_s1] sm:$0xff]  ;;  %v18_v1 = vld [vmem:[%s400_s1 + $0x8] sm:$0xff]  ;;  %v19_v2 = vld [vmem:[%s400_s1 + $0x10] sm:$0xff] }
   0x2   :  { %v276_v3 = vpack.c.bf16 %v18_v1, %v17_v0  ;;  %v20_v4 = vld [vmem:[%s400_s1 + $0x18] sm:$0xff]  ;;  %v21_v6 = vld [vmem:[%s400_s1 + $0x20] sm:$0xff]  ;;  %v22_v7 = vld [vmem:[%s400_s1 + $0x28] sm:$0xff] }
   0x3   :  { %v280_v5 = vpack.c.bf16 %v20_v4, %v19_v2  ;;  %v15_v8 = vld [vmem:[%s399_s0] sm:$0xff] }
   0x4   :  { %277 = vmatprep.subr.bf16.mxu0 %v276_v3  ;;  %273 = vmatprep.mubr.msk.f32.mxu0 %vm25_vm0, %v15_v8 }
   0x5   :  { %8 = vsyncpa [#allocation3], 0  ;;  %279 = vmatpush3.bf16.msra.mxu0 %v276_v3  ;;  %v284_v9 = vpack.c.bf16 %v22_v7, %v21_v6  ;;  %v23_v10 = vld [vmem:[%s400_s1 + $0x30] sm:$0xff]  ;;  %v24_v11 = vld [vmem:[%s400_s1 + $0x38] sm:$0xff]  ;;  %s323_s1 = smov 127   ;;  %s325_s5 = smov 8  }
   0x6   :  { %281 = vmatprep.subr.bf16.mxu0 %v280_v5  ;;  %v288_v12 = vpack.c.bf16 %v24_v11, %v23_v10  ;;  %v16_v13 = vld [vmem:[%s399_s0 + $0x8] sm:$0xff]  ;;  %s324_s0 = smov 126   ;;  %s326_s6 = smov 15   ;;  %vm220_vm1 = vcmask 121856   ;;  %vm217_vm2 = vcmask 64512   ;;  %v223_v41 = vld [vmem:[%s401_s2] sm:$0xff] }
   0x7   :  { %vm226_vm3 = vcmask 171008   ;;  %s327_s9 = smov [#allocation2]  }
   0x8   :  { %s234_s10 = sshll.u32 %s327_s9, 4  ;;  %s235_s10 = int_to_ptr.vmem [resolvable:$true] %s234_s10 }
   0x9   :  { %283 = vmatpush3.bf16.msra.mxu0 %v280_v5  ;;  %s299_s11 = scalar_lea.vmem %s235_s10, 256  ;;  %p304_p1 = scmp.lt.s32.totalorder %s235_s10, %s235_s10 }
   0xa   :  { %285 = vmatprep.subr.bf16.mxu0 %v284_v9  ;;  %p300_p0 = scmp.ne.s32.totalorder %s235_s10, %s299_s11  ;;  %p305_p2 = scmp.lt.s32.totalorder %s299_s11, %s299_s11 }
   0xc   :  { %p306_p3 = por %p305_p2, %p304_p1 }
   0xd   :  { %287 = vmatpush3.bf16.msra.mxu0 %v284_v9 }
   0xe   :  { %289 = vmatprep.subr.bf16.mxu0 %v288_v12  ;;  %p307_p4 = pnand %p306_p3, %p300_p0 }
  0x11   :  { %291 = vmatpush3.bf16.msra.mxu0 %v288_v12 }
  0x14   :  { %274 = vmatmul.mubr.msk.f32.vlgmr.msra.gmra.mrb[0].mxu0 %vm25_vm0, %v16_v13 }
  0xe7   :  { %v275_v14 = vpop.f32.mrb[0].mxu0 }
  0xe8   :  { %v98_v15 = vpop.f32.mrb[1].mxu0 }
  0xe9   :  { %107 = vxpose.xlu0.b32.start.end [1/1] (short) (narrow) %v98_v15, 48 }
  0xfe   :  { %139 = vxpose.xlu0.b32.start.end [1/1] (short) (narrow) %v275_v14, 48 }
 0x169   :  { %v123_v16 = vpop.trf.xlu0 }
 0x16d   :  { %v124_v17 = vpop.trf.xlu0 }
 0x171   :  { %v125_v18 = vpop.trf.xlu0 }
 0x175   :  { %v126_v19 = vpop.trf.xlu0 }
 0x179   :  { %v127_v20 = vpop.trf.xlu0 }
 0x17d   :  { %v128_v21 = vpop.trf.xlu0 }
 0x181   :  { %v155_v22 = vpop.trf.xlu0 }
 0x185   :  { %v156_v23 = vpop.trf.xlu0 }
 0x189   :  { %v157_v24 = vpop.trf.xlu0 }
 0x18a   :  { %175 = vrot.lane.b32.xlu1 %v157_v24, %s323_s1 }
 0x18d   :  { %v158_v25 = vpop.trf.xlu0 }
 0x18e   :  { %173 = vrot.lane.b32.xlu1 %v125_v18, %s323_s1 }
 0x191   :  { %v159_v26 = vpop.trf.xlu0 }
 0x192   :  { %185 = vrot.lane.b32.xlu1 %v159_v26, %s323_s1 }
 0x195   :  { %v160_v27 = vpop.trf.xlu0 }
 0x196   :  { %183 = vrot.lane.b32.xlu1 %v127_v20, %s323_s1 }
 0x19a   :  { %193 = vrot.lane.b32.xlu1 %v128_v21, %s324_s0 }
 0x19e   :  { %195 = vrot.lane.b32.xlu1 %v160_v27, %s324_s0 }
 0x1fc   :  { %v176_v28 = vpop.permute.xlu1 %175 }
 0x1fd   :  { %v180_v29 = vadd.f32 %v176_v28, %v156_v23 }
 0x1ff   :  { %205 = vrot.lane.b32.xlu0 %v180_v29, %s325_s5 }
 0x200   :  { %v174_v30 = vpop.permute.xlu1 %173 }
 0x201   :  { %v179_v31 = vadd.f32 %v174_v30, %v124_v17 }
 0x203   :  { %203 = vrot.lane.b32.xlu1 %v179_v31, %s325_s5 }
 0x204   :  { %v186_v32 = vpop.permute.xlu1 %185 }
 0x205   :  { %v190_v37 = vadd.f32 %v186_v32, %v158_v25 }
 0x208   :  { %v184_v33 = vpop.permute.xlu1 %183 }
 0x209   :  { %v189_v34 = vadd.f32 %v184_v33, %v126_v19 }
 0x20c   :  { %v194_v35 = vpop.permute.xlu1 %193 }
 0x20d   :  { %v199_v36 = vadd.f32 %v194_v35, %v189_v34 }
 0x20f   :  { %211 = vrot.lane.b32.xlu1 %v199_v36, %s326_s6 }
 0x210   :  { %v196_v38 = vpop.permute.xlu1 %195 }
 0x211   :  { %v200_v39 = vadd.f32 %v196_v38, %v190_v37 }
 0x213   :  { %213 = vrot.lane.b32.xlu1 %v200_v39, %s326_s6 }
 0x271   :  { %v206_v44 = vpop.permute.xlu0 %205 }
 0x272   :  { %v219_v47 = vsel %vm217_vm2, %v155_v22, %v206_v44 }
 0x275   :  { %v204_v40 = vpop.permute.xlu1 %203 }
 0x276   :  { %v218_v42 = vsel %vm217_vm2, %v123_v16, %v204_v40 }
 0x281   :  { %v212_v43 = vpop.permute.xlu1 %211 }
 0x282   :  { %v221_v45 = vsel %vm220_vm1, %v218_v42, %v212_v43 }
 0x283   :  { %v224_v46 = vadd.f32 %v223_v41, %v221_v45 }
 0x285   :  { %227 = vst.msk [vmem:[#allocation2] sm:$0xff] %vm226_vm3, %v224_v46  ;;  %v214_v48 = vpop.permute.xlu1 %213 }
 0x286   :  { %v222_v49 = vsel %vm220_vm1, %v219_v47, %v214_v48 }
 0x287   :  { %v225_v50 = vadd.f32 %v223_v41, %v222_v49 }
 0x289   :  { %228 = vst.msk [vmem:[#allocation2 + $0x8] sm:$0xff] %vm226_vm3, %v225_v50 }
 0x28a   :  { %310 = shalt.err (!%p307_p4)
}
 0x28b   :  { %s311_s13 = scalar_lea.hbm %s402_s3, 256 }
 0x28c   :  { %p312_p5 = scmp.ne.s32.totalorder %s402_s3, %s311_s13  ;;  %p315_p6 = scmp.lt.u32.totalorder %s311_s13, %s402_s3 }
 0x28e   :  { %p317_p7 = pnand %p315_p6, %p312_p5 }
 0x290   :  { %320 = shalt.err (!%p317_p7)
}
 0x291   :  { %s328_s18 = smov 128  }
 0x292   :  { %240 = dma.vmem_to_hbm [thread:$0]  %s235_s10, 256, %s402_s3, [#allocation3], %s328_s18, %s328_s18, %s325_s5  }
 0x293   :  { %321 = dma.done.wait [#allocation3], 256  }
 0x294   :  { %322 = vsyncadd [#allocation3], 4294967040 }
 0x295   :  { %244 = vsyncpa [#allocation3], 1 }

</bundles_post_ra>
